<compile_context>
chip_gen: v7x
topology: tpu7x:2x2x1
jax: 0.10.0
libtpu: 0.0.40
codegen_flags: <defaults>
</compile_context>

<pallas_src>
import functools

import jax
import jax.numpy as jnp
import numpy as np
from jax.experimental import pallas as pl
from jax.experimental.pallas import tpu as pltpu


# ----------------------------------------------------------------------------
# Kernels
# ----------------------------------------------------------------------------
def _ga_kernel_lane_dense(ave_ref, itm_ref, adj_ref, wgt_ref,
                          t_rep_ref, e_rep_ref, w1a_bd_ref, w1b_exp_ref,
                          w2_blk_ref, w3a_ref, w3b_tiled_ref,
                          out_ref, *, approx_recip):
    """Lane-dense path (D < 128). adj arrives as (tm, K*D); only 2-D tensors here."""
    f32 = jnp.float32
    ave = ave_ref[...].astype(f32)            # (tm, D)
    itm = itm_ref[...].astype(f32)            # (tm, D)
    adj = adj_ref[...].astype(f32)            # (tm, K*D)   lane-dense big stream
    wgt = wgt_ref[...].astype(f32)            # (tm, K)

    # Replicate ave across the K lane-blocks with a precomputed 0/1 matrix (MXU,
    # avoids any in-kernel lane concat / relayout).
    ave_exp = jnp.dot(ave, t_rep_ref[...], preferred_element_type=f32)   # (tm, K*D)
    alpha = ave_exp * adj                                                # (tm, K*D)

    # cat([alpha, wgt], -1) @ w_1, per neighbour block, as one block-diagonal matmul.
    h = jnp.dot(alpha, w1a_bd_ref[...], preferred_element_type=f32)      # (tm, K*D)
    h = h + jnp.dot(wgt, w1b_exp_ref[...], preferred_element_type=f32)   # + wgt*w_1[D]

    # leaky_relu(negative_slope=0.2): 2 VALU ops instead of cmp+mul+select.
    h = jnp.maximum(h, 0.2 * h)

    # per-block @ w_2 -> attention scores (tm, K)
    s = jnp.dot(h, w2_blk_ref[...], preferred_element_type=f32)          # (tm, K)

    # softmax over K; normalisation folded into the output below.
    s = s - jnp.max(s, axis=-1, keepdims=True)
    e = jnp.exp(s)                                                       # (tm, K)
    inv_l = pl.reciprocal(jnp.sum(e, axis=-1, keepdims=True), approx=approx_recip)

    # attended sum folded straight into the w_3[D:] matmul:
    #   (sum_k softmax_k * adj_k) @ w3b == inv_l * ((e_expanded * adj) @ tile(w3b, K))
    e_exp = jnp.dot(e, e_rep_ref[...], preferred_element_type=f32)       # (tm, K*D)
    prod = e_exp * adj                                                   # (tm, K*D)
    att_w3b = jnp.dot(prod, w3b_tiled_ref[...], preferred_element_type=f32)  # (tm, D)

    # TODO(synk): dropout is eval-mode identity; training-mode RNG dropout omitted.
    out = jnp.dot(itm, w3a_ref[...], preferred_element_type=f32) + inv_l * att_w3b
    # TODO(synk): out store stays lane-masked when D < 128; folding 128/D row-groups
    # into lanes would need an in-kernel sublane->lane relayout (not done for safety).
    out_ref[...] = jnp.maximum(out, 0.0).astype(out_ref.dtype)


def _ga_kernel_general(ave_ref, itm_ref, adj_ref, wgt_ref,
                       w1a_ref, w1b_ref, w2t_ref, w3a_ref, w3b_ref,
                       out_ref, *, approx_recip):
    """General path (D >= 128): lanes are already dense; keep the rank-3 adj block
    but do the w_1 contraction as one large 2-D matmul via a leading-dim collapse."""
    f32 = jnp.float32
    ave = ave_ref[...].astype(f32)            # (tm, D)
    itm = itm_ref[...].astype(f32)            # (tm, D)
    adj = adj_ref[...].astype(f32)            # (tm, K, D)
    wgt = wgt_ref[...].astype(f32)            # (tm, K)
    tm, K, D = adj.shape

    alpha = ave[:, None, :] * adj                                        # (tm, K, D)
    # Single big MXU matmul; collapsing leading dims is layout-free when K % 8 == 0.
    h = jnp.dot(alpha.reshape(tm * K, D), w1a_ref[...],
                preferred_element_type=f32).reshape(tm, K, D)
    h = h + wgt[:, :, None] * w1b_ref[...][None, :, :]
    h = jnp.maximum(h, 0.2 * h)                                          # leaky_relu 0.2

    s = jnp.sum(h * w2t_ref[...][None, :, :], axis=-1)                   # (tm, K)
    s = s - jnp.max(s, axis=-1, keepdims=True)
    e = jnp.exp(s)
    inv_l = pl.reciprocal(jnp.sum(e, axis=-1, keepdims=True), approx=approx_recip)
    att = jnp.sum(e[:, :, None] * adj, axis=1) * inv_l                   # (tm, D)

    # TODO(synk): dropout is eval-mode identity; training-mode RNG dropout omitted.
    out = (jnp.dot(itm, w3a_ref[...], preferred_element_type=f32)
           + jnp.dot(att, w3b_ref[...], preferred_element_type=f32))
    out_ref[...] = jnp.maximum(out, 0.0).astype(out_ref.dtype)


# ----------------------------------------------------------------------------
# Tiling / VMEM helpers
# ----------------------------------------------------------------------------
def _vmem_limit_bytes():
    """Generation-aware scoped-VMEM limit: ~half of physical, capped at 48 MiB.
    -> 48 MiB on v5e/v6e (128 MiB physical), 32 MiB on v7x (64 MiB physical)."""
    try:
        cap = int(pltpu.get_tpu_info().vmem_capacity_bytes)
    except Exception:
        cap = 64 * 1024 * 1024        # conservative fallback (v7x per-core)
    return max(32 * 1024 * 1024, min(48 * 1024 * 1024, cap // 2))


def _choose_tm(M, K, D, stream_itemsize, vmem_limit):
    """Largest 16-aligned row tile that fits: streamed inputs (double-buffered) +
    f32 in-kernel intermediates (~3 K*D slabs) + f32 output (double-buffered)."""
    stream_row = (K * D + 2 * D) * stream_itemsize + K * 4
    interm_row = 3 * K * D * 4 + 2 * D * 4
    budget = vmem_limit // 2          # leave headroom for weights + compiler scratch
    tm = budget // (2 * stream_row + interm_row)
    tm = (int(tm) // 16) * 16
    tm = max(16, min(1024, tm))
    mp16 = ((M + 15) // 16) * 16
    if mp16 >= 4 * 16:
        # keep >= 4 grid steps so the BlockSpec pipeline can overlap DMA with compute
        # and v7x's two TensorCores both get work via dimension_semantics=("parallel",).
        tm = min(tm, max(16, ((mp16 // 4) // 16) * 16))
    tm = min(tm, mp16)
    return tm


# ----------------------------------------------------------------------------
# Wrapper
# ----------------------------------------------------------------------------
def global_aggregator(batch_size, itm_emb, ave_sess_itms_emb,
                      glob_adj_itm_embs, glob_adj_wgt_embs,
                      w_1, w_2, w_3, *, stream_dtype=jnp.bfloat16, tm=None):
    """Pallas implementation of GlobalAggregator.forward (inference mode)."""
    B, N, D = itm_emb.shape
    K = glob_adj_itm_embs.shape[2]
    M = B * N
    out_dtype = itm_emb.dtype
    f32 = jnp.float32

    stream_dtype = jnp.dtype(stream_dtype)
    # approx reciprocal only when the accuracy budget is already loosened by bf16
    approx_recip = stream_dtype == jnp.dtype(jnp.bfloat16)
    lane_dense = (D < 128) and (K * D <= 2048)

    itm = itm_emb.reshape(M, D).astype(stream_dtype)
    ave = ave_sess_itms_emb.reshape(M, D).astype(stream_dtype)
    wgt = glob_adj_wgt_embs.reshape(M, K).astype(f32)
    if lane_dense:
        # free (row-major) metadata reshape -> lane-dense K*D stream
        adj = glob_adj_itm_embs.reshape(M, K * D).astype(stream_dtype)
    else:
        adj = glob_adj_itm_embs.reshape(M, K, D).astype(stream_dtype)

    vmem_limit = _vmem_limit_bytes()
    if tm is None:
        tm = _choose_tm(M, K, D, stream_dtype.itemsize, vmem_limit)

    # pad rows to a multiple of tm; padded rows are all-zero -> finite outputs,
    # sliced off below.
    Mp = pl.cdiv(M, tm) * tm
    if Mp != M:
        pad = Mp - M
        itm = jnp.pad(itm, ((0, pad), (0, 0)))
        ave = jnp.pad(ave, ((0, pad), (0, 0)))
        wgt = jnp.pad(wgt, ((0, pad), (0, 0)))
        adj = jnp.pad(adj, ((0, pad),) + ((0, 0),) * (adj.ndim - 1))

    # parameter splits (plain-JAX glue, computed once per call)
    w_1 = w_1.astype(f32); w_2 = w_2.astype(f32); w_3 = w_3.astype(f32)
    w1a, w1b = w_1[:D, :], w_1[D:, :]            # (D, D), (1, D)
    w3a, w3b = w_3[:D, :], w_3[D:, :]            # (D, D), (D, D)

    grid = (Mp // tm,)

    def row_spec(last):
        return pl.BlockSpec((tm, last), lambda i: (i, 0))

    def w_spec(shape):
        # grid-invariant weights: single-buffer them to save VMEM (fallback if the
        # running JAX version does not expose pipeline_mode / pl.Buffered).
        imap = lambda i: (0,) * len(shape)
        try:
            return pl.BlockSpec(shape, imap, pipeline_mode=pl.Buffered(1))
        except Exception:
            return pl.BlockSpec(shape, imap)

    common = dict(
        out_shape=jax.ShapeDtypeStruct((Mp, D), out_dtype),
        compiler_params=pltpu.CompilerParams(
            dimension_semantics=("parallel",),
            vmem_limit_bytes=vmem_limit),
    )

    if lane_dense:
        KD = K * D
        eyeK = jnp.eye(K, dtype=f32)
        t_rep = jnp.kron(jnp.ones((1, K), f32), jnp.eye(D, dtype=f32))  # (D, K*D)
        e_rep = jnp.kron(eyeK, jnp.ones((1, D), f32))                   # (K, K*D)
        w1a_bd = jnp.kron(eyeK, w1a)                                    # (K*D, K*D)
        w1b_exp = jnp.kron(eyeK, w1b)                                   # (K, K*D)
        w2_blk = jnp.kron(eyeK, w_2)                                    # (K*D, K)
        w3b_tiled = jnp.tile(w3b, (K, 1))                               # (K*D, D)

        out = pl.pallas_call(
            functools.partial(_ga_kernel_lane_dense, approx_recip=approx_recip),
            grid_spec=pltpu.PrefetchScalarGridSpec(
                num_scalar_prefetch=0,
                grid=grid,
                in_specs=[
                    row_spec(D),            # ave
                    row_spec(D),            # itm
                    row_spec(KD),           # adj (lane-dense)
                    row_spec(K),            # wgt
                    w_spec((D, KD)),        # t_rep
                    w_spec((K, KD)),        # e_rep
                    w_spec((KD, KD)),       # w1a block-diagonal
                    w_spec((K, KD)),        # w1b expanded
                    w_spec((KD, K)),        # w2 block
                    w_spec((D, D)),         # w3a
                    w_spec((KD, D)),        # w3b tiled
                ],
                out_specs=pl.BlockSpec((tm, D), lambda i: (i, 0)),
            ),
            **common,
        )(ave, itm, adj, wgt, t_rep, e_rep, w1a_bd, w1b_exp, w2_blk, w3a, w3b_tiled)
    else:
        w2t = w_2.T                                                     # (1, D)
        out = pl.pallas_call(
            functools.partial(_ga_kernel_general, approx_recip=approx_recip),
            grid_spec=pltpu.PrefetchScalarGridSpec(
                num_scalar_prefetch=0,
                grid=grid,
                in_specs=[
                    row_spec(D),                                        # ave
                    row_spec(D),                                        # itm
                    pl.BlockSpec((tm, K, D), lambda i: (i, 0, 0)),      # adj
                    row_spec(K),                                        # wgt
                    w_spec((D, D)),                                     # w1a
                    w_spec((1, D)),                                     # w1b
                    w_spec((1, D)),                                     # w2^T
                    w_spec((D, D)),                                     # w3a
                    w_spec((D, D)),                                     # w3b
                ],
                out_specs=pl.BlockSpec((tm, D), lambda i: (i, 0)),
            ),
            **common,
        )(ave, itm, adj, wgt, w1a, w1b, w2t, w3a, w3b)

    return out[:M].reshape(batch_size, -1, D)


# ----------------------------------------------------------------------------
# Pure-JAX reference (mirrors the PyTorch forward, eval mode)
# ----------------------------------------------------------------------------
def global_aggregator_ref(batch_size, itm_emb, ave, adj, wgt, w_1, w_2, w_3):
    B, N, D = itm_emb.shape
    K = adj.shape[2]
    ave_r = jnp.broadcast_to(ave[:, :, None, :], (B, N, K, D))
    alpha = ave_r * adj
    alpha = jnp.concatenate([alpha, wgt[..., None]], axis=-1)
    alpha = jnp.matmul(alpha, w_1)
    alpha = jnp.where(alpha >= 0, alpha, 0.2 * alpha)
    alpha = jnp.matmul(alpha, w_2)[..., 0]
    alpha = jax.nn.softmax(alpha, axis=-1)[..., None]
    att = jnp.sum(alpha * adj, axis=-2)
    g = jnp.concatenate([itm_emb, att], axis=-1)
    g = jnp.matmul(g, w_3)
    g = g.reshape(batch_size, -1, D)
    return jnp.maximum(g, 0.0)


if __name__ == "__main__":
    B, N, K, D = 2, 8, 8, 32
    key = jax.random.PRNGKey(0)
    k = jax.random.split(key, 7)

    itm_emb = jax.random.normal(k[0], (B, N, D), dtype=jnp.float32)
    ave_sess = jax.random.normal(k[1], (B, N, D), dtype=jnp.float32)
    adj_embs = jax.random.normal(k[2], (B, N, K, D), dtype=jnp.float32)
    adj_wgts = jax.random.normal(k[3], (B, N, K), dtype=jnp.float32)

    # deterministic parameter init (module defines only shapes)
    scale = 1.0 / np.sqrt(D)
    w_1 = jax.random.uniform(k[4], (D + 1, D), jnp.float32, -scale, scale)
    w_2 = jax.random.uniform(k[5], (D, 1), jnp.float32, -scale, scale)
    w_3 = jax.random.uniform(k[6], (2 * D, D), jnp.float32, -scale, scale)

    ref = jax.block_until_ready(global_aggregator_ref(
        B, itm_emb, ave_sess, adj_embs, adj_wgts, w_1, w_2, w_3))

    # 1) exact-path check: f32 streaming, exact reciprocal -> tight tolerance.
    out_f32 = jax.block_until_ready(global_aggregator(
        B, itm_emb, ave_sess, adj_embs, adj_wgts, w_1, w_2, w_3,
        stream_dtype=jnp.float32))
    assert out_f32.shape == (B, N, D), out_f32.shape
    np.testing.assert_allclose(np.asarray(out_f32), np.asarray(ref),
                               rtol=1e-5, atol=1e-5)

    # 2) default fast path: bf16 streaming of the HBM-bound tensors, f32 accumulation.
    out_bf16 = jax.block_until_ready(global_aggregator(
        B, itm_emb, ave_sess, adj_embs, adj_wgts, w_1, w_2, w_3))
    assert out_bf16.shape == (B, N, D), out_bf16.shape
    np.testing.assert_allclose(np.asarray(out_bf16), np.asarray(ref),
                               rtol=2e-2, atol=2e-2)

    print("KERNEL_OK")
</pallas_src>

<mosaic_0001>
module attributes {stable_mosaic.version = 11 : i64} {
  func.func @_ga_kernel_lane_dense(%arg0: i32, %arg1: memref<16x32xf32, #tpu.memory_space<vmem>>, %arg2: memref<16x32xf32, #tpu.memory_space<vmem>>, %arg3: memref<16x256xf32, #tpu.memory_space<vmem>>, %arg4: memref<16x8xf32, #tpu.memory_space<vmem>>, %arg5: memref<32x256xf32, #tpu.memory_space<vmem>>, %arg6: memref<8x256xf32, #tpu.memory_space<vmem>>, %arg7: memref<256x256xf32, #tpu.memory_space<vmem>>, %arg8: memref<8x256xf32, #tpu.memory_space<vmem>>, %arg9: memref<256x8xf32, #tpu.memory_space<vmem>>, %arg10: memref<32x32xf32, #tpu.memory_space<vmem>>, %arg11: memref<256x32xf32, #tpu.memory_space<vmem>>, %arg12: memref<16x32xf32, #tpu.memory_space<vmem>>) attributes {dimension_semantics = [#tpu.dimension_semantics<parallel>], iteration_bounds = array<i64: 1>, scalar_prefetch = 0 : i64, scratch_operands = 0 : i64, tpu.core_type = #tpu.core_type<tc>, window_params = [{transform_indices = @transform_0, window_bounds = array<i64: 16, 32>}, {transform_indices = @transform_1, window_bounds = array<i64: 16, 32>}, {transform_indices = @transform_2, window_bounds = array<i64: 16, 256>}, {transform_indices = @transform_3, window_bounds = array<i64: 16, 8>}, {pipeline_mode = #tpu.pipeline_mode<synchronous>, transform_indices = @transform_4, window_bounds = array<i64: 32, 256>}, {pipeline_mode = #tpu.pipeline_mode<synchronous>, transform_indices = @transform_5, window_bounds = array<i64: 8, 256>}, {pipeline_mode = #tpu.pipeline_mode<synchronous>, transform_indices = @transform_6, window_bounds = array<i64: 256, 256>}, {pipeline_mode = #tpu.pipeline_mode<synchronous>, transform_indices = @transform_7, window_bounds = array<i64: 8, 256>}, {pipeline_mode = #tpu.pipeline_mode<synchronous>, transform_indices = @transform_8, window_bounds = array<i64: 256, 8>}, {pipeline_mode = #tpu.pipeline_mode<synchronous>, transform_indices = @transform_9, window_bounds = array<i64: 32, 32>}, {pipeline_mode = #tpu.pipeline_mode<synchronous>, transform_indices = @transform_10, window_bounds = array<i64: 256, 32>}, {transform_indices = @transform_11, window_bounds = array<i64: 16, 32>}]} {
    %c0 = arith.constant 0 : index
    %c0_0 = arith.constant 0 : index
    %0 = vector.load %arg1[%c0, %c0_0] : memref<16x32xf32, #tpu.memory_space<vmem>>, vector<16x32xf32>
    %c0_1 = arith.constant 0 : index
    %c0_2 = arith.constant 0 : index
    %1 = vector.load %arg2[%c0_1, %c0_2] : memref<16x32xf32, #tpu.memory_space<vmem>>, vector<16x32xf32>
    %c0_3 = arith.constant 0 : index
    %c0_4 = arith.constant 0 : index
    %2 = vector.load %arg3[%c0_3, %c0_4] : memref<16x256xf32, #tpu.memory_space<vmem>>, vector<16x256xf32>
    %c0_5 = arith.constant 0 : index
    %c0_6 = arith.constant 0 : index
    %3 = vector.load %arg4[%c0_5, %c0_6] : memref<16x8xf32, #tpu.memory_space<vmem>>, vector<16x8xf32>
    %c0_7 = arith.constant 0 : index
    %c0_8 = arith.constant 0 : index
    %4 = vector.load %arg5[%c0_7, %c0_8] : memref<32x256xf32, #tpu.memory_space<vmem>>, vector<32x256xf32>
    %cst = arith.constant dense<0.000000e+00> : vector<16x256xf32>
    %5 = tpu.matmul %0, %4, %cst {dimension_numbers = #tpu.dot_dimension_numbers<[1], [0], [0], [1], [0, 0, 1, 1], [], []>} : vector<16x32xf32>, vector<32x256xf32>, vector<16x256xf32> -> vector<16x256xf32>
    %6 = arith.mulf %5, %2 : vector<16x256xf32>
    %c0_9 = arith.constant 0 : index
    %c0_10 = arith.constant 0 : index
    %7 = vector.load %arg7[%c0_9, %c0_10] : memref<256x256xf32, #tpu.memory_space<vmem>>, vector<256x256xf32>
    %cst_11 = arith.constant dense<0.000000e+00> : vector<16x256xf32>
    %8 = tpu.matmul %6, %7, %cst_11 {dimension_numbers = #tpu.dot_dimension_numbers<[1], [0], [0], [1], [0, 0, 1, 1], [], []>} : vector<16x256xf32>, vector<256x256xf32>, vector<16x256xf32> -> vector<16x256xf32>
    %c0_12 = arith.constant 0 : index
    %c0_13 = arith.constant 0 : index
    %9 = vector.load %arg8[%c0_12, %c0_13] : memref<8x256xf32, #tpu.memory_space<vmem>>, vector<8x256xf32>
    %cst_14 = arith.constant dense<0.000000e+00> : vector<16x256xf32>
    %10 = tpu.matmul %3, %9, %cst_14 {dimension_numbers = #tpu.dot_dimension_numbers<[1], [0], [0], [1], [0, 0, 1, 1], [], []>} : vector<16x8xf32>, vector<8x256xf32>, vector<16x256xf32> -> vector<16x256xf32>
    %11 = arith.addf %8, %10 : vector<16x256xf32>
    %cst_15 = arith.constant 2.000000e-01 : f32
    %12 = vector.broadcast %cst_15 : f32 to vector<16x256xf32>
    %13 = arith.mulf %12, %11 : vector<16x256xf32>
    %14 = arith.maximumf %11, %13 : vector<16x256xf32>
    %c0_16 = arith.constant 0 : index
    %c0_17 = arith.constant 0 : index
    %15 = vector.load %arg9[%c0_16, %c0_17] : memref<256x8xf32, #tpu.memory_space<vmem>>, vector<256x8xf32>
    %cst_18 = arith.constant dense<0.000000e+00> : vector<16x8xf32>
    %16 = tpu.matmul %14, %15, %cst_18 {dimension_numbers = #tpu.dot_dimension_numbers<[1], [0], [0], [1], [0, 0, 1, 1], [], []>} : vector<16x256xf32>, vector<256x8xf32>, vector<16x8xf32> -> vector<16x8xf32>
    %cst_19 = arith.constant dense<0xFF800000> : vector<16xf32>
    %17 = vector.multi_reduction <maximumf>, %16, %cst_19 [1] : vector<16x8xf32> to vector<16xf32>
    %18 = vector.shape_cast %17 : vector<16xf32> to vector<16x1xf32>
    %19 = vector.broadcast %18 : vector<16x1xf32> to vector<16x8xf32>
    %20 = arith.subf %16, %19 : vector<16x8xf32>
    %21 = math.exp %20 : vector<16x8xf32>
    %cst_20 = arith.constant dense<0.000000e+00> : vector<16xf32>
    %22 = vector.multi_reduction <add>, %21, %cst_20 [1] : vector<16x8xf32> to vector<16xf32>
    %23 = vector.shape_cast %22 : vector<16xf32> to vector<16x1xf32>
    %24 = tpu.reciprocal %23 : vector<16x1xf32> -> vector<16x1xf32>
    %c0_21 = arith.constant 0 : index
    %c0_22 = arith.constant 0 : index
    %25 = vector.load %arg6[%c0_21, %c0_22] : memref<8x256xf32, #tpu.memory_space<vmem>>, vector<8x256xf32>
    %cst_23 = arith.constant dense<0.000000e+00> : vector<16x256xf32>
    %26 = tpu.matmul %21, %25, %cst_23 {dimension_numbers = #tpu.dot_dimension_numbers<[1], [0], [0], [1], [0, 0, 1, 1], [], []>} : vector<16x8xf32>, vector<8x256xf32>, vector<16x256xf32> -> vector<16x256xf32>
    %27 = arith.mulf %26, %2 : vector<16x256xf32>
    %c0_24 = arith.constant 0 : index
    %c0_25 = arith.constant 0 : index
    %28 = vector.load %arg11[%c0_24, %c0_25] : memref<256x32xf32, #tpu.memory_space<vmem>>, vector<256x32xf32>
    %cst_26 = arith.constant dense<0.000000e+00> : vector<16x32xf32>
    %29 = tpu.matmul %27, %28, %cst_26 {dimension_numbers = #tpu.dot_dimension_numbers<[1], [0], [0], [1], [0, 0, 1, 1], [], []>} : vector<16x256xf32>, vector<256x32xf32>, vector<16x32xf32> -> vector<16x32xf32>
    %c0_27 = arith.constant 0 : index
    %c0_28 = arith.constant 0 : index
    %30 = vector.load %arg10[%c0_27, %c0_28] : memref<32x32xf32, #tpu.memory_space<vmem>>, vector<32x32xf32>
    %cst_29 = arith.constant dense<0.000000e+00> : vector<16x32xf32>
    %31 = tpu.matmul %1, %30, %cst_29 {dimension_numbers = #tpu.dot_dimension_numbers<[1], [0], [0], [1], [0, 0, 1, 1], [], []>} : vector<16x32xf32>, vector<32x32xf32>, vector<16x32xf32> -> vector<16x32xf32>
    %32 = vector.broadcast %24 : vector<16x1xf32> to vector<16x32xf32>
    %33 = arith.mulf %32, %29 : vector<16x32xf32>
    %34 = arith.addf %31, %33 : vector<16x32xf32>
    %cst_30 = arith.constant 0.000000e+00 : f32
    %35 = vector.broadcast %cst_30 : f32 to vector<16x32xf32>
    %36 = arith.maximumf %34, %35 : vector<16x32xf32>
    %c0_31 = arith.constant 0 : index
    %c0_32 = arith.constant 0 : index
    %37 = vector.load %arg12[%c0_31, %c0_32] : memref<16x32xf32, #tpu.memory_space<vmem>>, vector<16x32xf32>
    tpu.vector_store %arg12[%c0_31, %c0_32], %36 {strides = array<i32>} : memref<16x32xf32, #tpu.memory_space<vmem>>, vector<16x32xf32>,
    return
  }
  func.func @transform_0(%arg0: i32) -> (i32, i32) {
    %c0_i32 = arith.constant 0 : i32
    %c0_i32_0 = arith.constant 0 : i32
    return %arg0, %c0_i32 : i32, i32
  }
  func.func @transform_1(%arg0: i32) -> (i32, i32) {
    %c0_i32 = arith.constant 0 : i32
    %c0_i32_0 = arith.constant 0 : i32
    return %arg0, %c0_i32 : i32, i32
  }
  func.func @transform_2(%arg0: i32) -> (i32, i32) {
    %c0_i32 = arith.constant 0 : i32
    %c0_i32_0 = arith.constant 0 : i32
    return %arg0, %c0_i32 : i32, i32
  }
  func.func @transform_3(%arg0: i32) -> (i32, i32) {
    %c0_i32 = arith.constant 0 : i32
    %c0_i32_0 = arith.constant 0 : i32
    return %arg0, %c0_i32 : i32, i32
  }
  func.func @transform_4(%arg0: i32) -> (i32, i32) {
    %c0_i32 = arith.constant 0 : i32
    %c0_i32_0 = arith.constant 0 : i32
    %c0_i32_1 = arith.constant 0 : i32
    return %c0_i32, %c0_i32_0 : i32, i32
  }
  func.func @transform_5(%arg0: i32) -> (i32, i32) {
    %c0_i32 = arith.constant 0 : i32
    %c0_i32_0 = arith.constant 0 : i32
    %c0_i32_1 = arith.constant 0 : i32
    return %c0_i32, %c0_i32_0 : i32, i32
  }
  func.func @transform_6(%arg0: i32) -> (i32, i32) {
    %c0_i32 = arith.constant 0 : i32
    %c0_i32_0 = arith.constant 0 : i32
    %c0_i32_1 = arith.constant 0 : i32
    return %c0_i32, %c0_i32_0 : i32, i32
  }
  func.func @transform_7(%arg0: i32) -> (i32, i32) {
    %c0_i32 = arith.constant 0 : i32
    %c0_i32_0 = arith.constant 0 : i32
    %c0_i32_1 = arith.constant 0 : i32
    return %c0_i32, %c0_i32_0 : i32, i32
  }
  func.func @transform_8(%arg0: i32) -> (i32, i32) {
    %c0_i32 = arith.constant 0 : i32
    %c0_i32_0 = arith.constant 0 : i32
    %c0_i32_1 = arith.constant 0 : i32
    return %c0_i32, %c0_i32_0 : i32, i32
  }
  func.func @transform_9(%arg0: i32) -> (i32, i32) {
    %c0_i32 = arith.constant 0 : i32
    %c0_i32_0 = arith.constant 0 : i32
    %c0_i32_1 = arith.constant 0 : i32
    return %c0_i32, %c0_i32_0 : i32, i32
  }
  func.func @transform_10(%arg0: i32) -> (i32, i32) {
    %c0_i32 = arith.constant 0 : i32
    %c0_i32_0 = arith.constant 0 : i32
    %c0_i32_1 = arith.constant 0 : i32
    return %c0_i32, %c0_i32_0 : i32, i32
  }
  func.func @transform_11(%arg0: i32) -> (i32, i32) {
    %c0_i32 = arith.constant 0 : i32
    %c0_i32_0 = arith.constant 0 : i32
    return %arg0, %c0_i32 : i32, i32
  }
}

</mosaic_0001>

<bundles_post_ra>
// kernel: tpu_custom_call.1
= control target key start
LH: loop header
LB: loop body
LE: loop exit
PB: predicated region body
PF: predicated region fallthrough
CT: control target
= control target key end

     0   :  { %16 = vsyncpa [#allocation3], 0  ;;  %s1957_s0 = inlined_call_operand.hbm [shape: f32[16,32], index: 0, kind: input, shape index: {}]   ;;  %s1958_s1 = inlined_call_operand.hbm [shape: f32[16,32], index: 1, kind: input, shape index: {}]   ;;  %s1959_s2 = inlined_call_operand.hbm [shape: f32[16,256], index: 2, kind: input, shape index: {}]   ;;  %s1960_s3 = inlined_call_operand.vmem [shape: f32[16,8], index: 3, kind: input, shape index: {}]   ;;  %s1961_s4 = inlined_call_operand.vmem [shape: f32[32,256], index: 4, kind: input, shape index: {}]   ;;  %s1962_s5 = inlined_call_operand.hbm [shape: f32[8,256], index: 5, kind: input, shape index: {}]   ;;  %s1963_s6 = inlined_call_operand.vmem [shape: f32[256,256], index: 6, kind: input, shape index: {}]   ;;  %s1964_s7 = inlined_call_operand.hbm [shape: f32[8,256], index: 7, kind: input, shape index: {}]   ;;  %s1965_s8 = inlined_call_operand.vmem [shape: f32[256,8], index: 8, kind: input, shape index: {}]   ;;  %s1966_s9 = inlined_call_operand.hbm [shape: f32[32,32], index: 9, kind: input, shape index: {}]   ;;  %s1967_s10 = inlined_call_operand.vmem [shape: f32[256,32], index: 10, kind: input, shape index: {}]   ;;  %s1968_s11 = inlined_call_operand.hbm [shape: f32[16,32], index: 11, kind: output, shape index: {}]  }
   0x1   :  { %17 = vsyncpa [#allocation6], 0 }
   0x2   :  { %18 = vsyncpa [#allocation9], 0 }
   0x3   :  { %19 = vsyncpa [#allocation12], 0 }
   0x4   :  { %20 = vsyncpa [#allocation4], 0  ;;  %s1325_s17 = smov [#allocation5]   ;;  %s1326_s19 = smov [#allocation8]  }
   0x5   :  { %s38_s18 = sshll.u32 %s1325_s17, 4  ;;  %s67_s20 = sshll.u32 %s1326_s19, 4  ;;  %s39_s18 = int_to_ptr.vmem [resolvable:$true] %s38_s18  ;;  %s68_s20 = int_to_ptr.vmem [resolvable:$true] %s67_s20 }
   0x6   :  { %s1161_s23 = scalar_lea.hbm %s1958_s1, 256 }
   0x7   :  { %p1162_p0 = scmp.ne.s32.totalorder %s1958_s1, %s1161_s23  ;;  %p1165_p1 = scmp.lt.u32.totalorder %s1161_s23, %s1958_s1 }
   0x9   :  { %p1167_p2 = pnand %p1165_p1, %p1162_p0 }
   0xb   :  { %1170 = shalt.err (!%p1167_p2)
}
   0xc   :  { %s1171_s28 = scalar_lea.vmem %s39_s18, 256  ;;  %p1176_p4 = scmp.lt.s32.totalorder %s39_s18, %s39_s18 }
   0xd   :  { %p1172_p3 = scmp.ne.s32.totalorder %s39_s18, %s1171_s28  ;;  %p1177_p5 = scmp.lt.s32.totalorder %s1171_s28, %s1171_s28 }
   0xf   :  { %p1178_p6 = por %p1177_p5, %p1176_p4 }
  0x11   :  { %p1179_p7 = pnand %p1178_p6, %p1172_p3 }
  0x13   :  { %1182 = shalt.err (!%p1179_p7)
}
  0x14   :  { %s1327_s29 = smov 128   ;;  %s1328_s30 = smov 8  }
  0x15   :  { %44 = dma.hbm_to_vmem [thread:$0]  %s1958_s1, 256, %s39_s18, [#allocation6], %s1327_s29, %s1327_s29, %s1328_s30  }
  0x16   :  { %s1183_s16 = scalar_lea.hbm %s1962_s5, 256 }
  0x17   :  { %p1184_p8 = scmp.ne.s32.totalorder %s1962_s5, %s1183_s16  ;;  %p1187_p9 = scmp.lt.u32.totalorder %s1183_s16, %s1962_s5 }
  0x19   :  { %p1189_p10 = pnand %p1187_p9, %p1184_p8 }
  0x1b   :  { %1192 = shalt.err (!%p1189_p10)
}
  0x1c   :  { %s1193_s23 = scalar_lea.vmem %s68_s20, 256  ;;  %p1198_p12 = scmp.lt.s32.totalorder %s68_s20, %s68_s20 }
  0x1d   :  { %p1194_p11 = scmp.ne.s32.totalorder %s68_s20, %s1193_s23  ;;  %p1199_p13 = scmp.lt.s32.totalorder %s1193_s23, %s1193_s23 }
  0x1f   :  { %p1200_p0 = por %p1199_p13, %p1198_p12 }
  0x21   :  { %p1201_p1 = pnand %p1200_p0, %p1194_p11 }
  0x23   :  { %1204 = shalt.err (!%p1201_p1)
}
  0x24   :  { %70 = dma.hbm_to_vmem [thread:$0]  %s1962_s5, 256, %s68_s20, [#allocation9]  }
  0x25   :  { %s1329_s24 = smov [#allocation2]   ;;  %s1330_s26 = smov [#allocation7]  }
  0x26   :  { %s26_s25 = sshll.u32 %s1329_s24, 4  ;;  %s50_s27 = sshll.u32 %s1330_s26, 4  ;;  %s27_s25 = int_to_ptr.vmem [resolvable:$true] %s26_s25  ;;  %s1424_s27 = int_to_ptr.vmem [resolvable:$true] %s50_s27 }
  0x27   :  { %s1205_s13 = scalar_lea.hbm %s1957_s0, 256 }
  0x28   :  { %p1206_p2 = scmp.ne.s32.totalorder %s1957_s0, %s1205_s13  ;;  %p1209_p3 = scmp.lt.u32.totalorder %s1205_s13, %s1957_s0 }
  0x2a   :  { %p1211_p4 = pnand %p1209_p3, %p1206_p2 }
  0x2c   :  { %1214 = shalt.err (!%p1211_p4)
}
  0x2d   :  { %s1215_s5 = scalar_lea.vmem %s27_s25, 256  ;;  %p1220_p6 = scmp.lt.s32.totalorder %s27_s25, %s27_s25 }
  0x2e   :  { %p1216_p5 = scmp.ne.s32.totalorder %s27_s25, %s1215_s5  ;;  %p1221_p7 = scmp.lt.s32.totalorder %s1215_s5, %s1215_s5 }
  0x30   :  { %p1222_p8 = por %p1221_p7, %p1220_p6 }
  0x32   :  { %p1223_p9 = pnand %p1222_p8, %p1216_p5 }
  0x34   :  { %1226 = shalt.err (!%p1223_p9)
}
  0x35   :  { %32 = dma.hbm_to_vmem [thread:$0]  %s1957_s0, 256, %s27_s25, [#allocation3], %s1327_s29, %s1327_s29, %s1328_s30  }
  0x36   :  { %s1227_s23 = scalar_lea.hbm %s1959_s2, 512 }
  0x37   :  { %p1228_p10 = scmp.ne.s32.totalorder %s1959_s2, %s1227_s23  ;;  %p1231_p11 = scmp.lt.u32.totalorder %s1227_s23, %s1959_s2 }
  0x39   :  { %p1233_p12 = pnand %p1231_p11, %p1228_p10 }
  0x3b   :  { %1236 = shalt.err (!%p1233_p12)
}
  0x3c   :  { %s1237_s28 = scalar_lea.vmem %s1424_s27, 512  ;;  %p1242_p0 = scmp.lt.s32.totalorder %s1424_s27, %s1424_s27 }
  0x3d   :  { %p1238_p13 = scmp.ne.s32.totalorder %s1424_s27, %s1237_s28  ;;  %p1243_p1 = scmp.lt.s32.totalorder %s1237_s28, %s1237_s28 }
  0x3f   :  { %p1244_p2 = por %p1243_p1, %p1242_p0 }
  0x41   :  { %p1245_p3 = pnand %p1244_p2, %p1238_p13 }
  0x43   :  { %1248 = shalt.err (!%p1245_p3)
}
  0x44   :  { %s1331_s0 = smov 256   ;;  %s1332_s25 = smov 16  }
  0x45   :  { %56 = dma.hbm_to_vmem [thread:$0]  %s1959_s2, 512, %s1424_s27, [#allocation6], %s1331_s0, %s1331_s0, %s1332_s25  }
  0x46   :  { %s1333_s14 = smov [#allocation10]   ;;  %s1334_s16 = smov [#allocation11]  }
  0x47   :  { %s79_s15 = sshll.u32 %s1333_s14, 4  ;;  %s90_s17 = sshll.u32 %s1334_s16, 4  ;;  %s80_s15 = int_to_ptr.vmem [resolvable:$true] %s79_s15  ;;  %s1458_s17 = int_to_ptr.vmem [resolvable:$true] %s90_s17 }
  0x48   :  { %s1249_s19 = scalar_lea.hbm %s1964_s7, 256 }
  0x49   :  { %p1250_p4 = scmp.ne.s32.totalorder %s1964_s7, %s1249_s19  ;;  %p1253_p5 = scmp.lt.u32.totalorder %s1249_s19, %s1964_s7 }
  0x4b   :  { %p1255_p6 = pnand %p1253_p5, %p1250_p4 }
  0x4d   :  { %1258 = shalt.err (!%p1255_p6)
}
  0x4e   :  { %s1259_s2 = scalar_lea.vmem %s80_s15, 256  ;;  %p1264_p8 = scmp.lt.s32.totalorder %s80_s15, %s80_s15 }
  0x4f   :  { %p1260_p7 = scmp.ne.s32.totalorder %s80_s15, %s1259_s2  ;;  %p1265_p9 = scmp.lt.s32.totalorder %s1259_s2, %s1259_s2 }
  0x51   :  { %p1266_p10 = por %p1265_p9, %p1264_p8 }
  0x53   :  { %p1267_p11 = pnand %p1266_p10, %p1260_p7 }
  0x55   :  { %1270 = shalt.err (!%p1267_p11)
}
  0x56   :  { %82 = dma.hbm_to_vmem [thread:$0]  %s1964_s7, 256, %s80_s15, [#allocation9]  }
  0x57   :  { %s1271_s28 = scalar_lea.hbm %s1966_s9, 512 }
  0x58   :  { %p1272_p12 = scmp.ne.s32.totalorder %s1966_s9, %s1271_s28  ;;  %p1275_p13 = scmp.lt.u32.totalorder %s1271_s28, %s1966_s9 }
  0x5a   :  { %p1277_p0 = pnand %p1275_p13, %p1272_p12 }
  0x5c   :  { %1280 = shalt.err (!%p1277_p0)
}
  0x5d   :  { %s1281_s14 = scalar_lea.vmem %s1458_s17, 512  ;;  %p1286_p2 = scmp.lt.s32.totalorder %s1458_s17, %s1458_s17 }
  0x5e   :  { %p1282_p1 = scmp.ne.s32.totalorder %s1458_s17, %s1281_s14  ;;  %p1287_p3 = scmp.lt.s32.totalorder %s1281_s14, %s1281_s14 }
  0x60   :  { %p1288_p4 = por %p1287_p3, %p1286_p2 }
  0x62   :  { %p1289_p5 = pnand %p1288_p4, %p1282_p1 }
  0x64   :  { %1292 = shalt.err (!%p1289_p5)
}
  0x65   :  { %96 = dma.hbm_to_vmem [thread:$0]  %s1966_s9, 512, %s1458_s17, [#allocation12], %s1327_s29, %s1327_s29, %s1328_s30  }
  0x66   :  { %1315 = dma.done.wait [#allocation3], 256  }
  0x67   :  { %1316 = vsyncadd [#allocation3], 4294967040 }
  0x68   :  { %1317 = dma.done.wait [#allocation6], 768  }
  0x69   :  { %1318 = vsyncadd [#allocation6], 4294966528 }
  0x6a   :  { %1319 = dma.done.wait [#allocation9], 512  }
  0x6b   :  { %1320 = vsyncadd [#allocation9], 4294966784 }
  0x6c   :  { %1321 = dma.done.wait [#allocation12], 512  }
  0x6d   :  { %1322 = vsyncadd [#allocation12], 4294966784  ;;  %v1335_v0 = vmov 0.0   ;;  %v128_v1 = vld [vmem:[%s1961_s4 + $0x8] sm:$0xff]  ;;  %v130_v2 = vld [vmem:[%s1961_s4 + $0x18] sm:$0xff]  ;;  %vm289_vm0 = vcmask 64512  }
  0x6e   :  { %206 = vmatprep.mubr.f32.mxu0 %v1335_v0  ;;  %360 = vmatprep.mubr.f32.mxu1 %v1335_v0  ;;  %v127_v3 = vld [vmem:[%s1961_s4] sm:$0xff]  ;;  %v993_v4 = vpack.c.bf16 %v130_v2, %v128_v1  ;;  %v129_v5 = vld [vmem:[%s1961_s4 + $0x10] sm:$0xff]  ;;  %v132_v6 = vld [vmem:[%s1961_s4 + $0x28] sm:$0xff]  ;;  %vm135_vm1 = vcmask 261120  }
  0x6f   :  { %v134_v7 = vld [vmem:[%s1961_s4 + $0x38] sm:$0xff]  ;;  %v995_v8 = vpack.c.bf16 %v129_v5, %v127_v3  ;;  %v131_v10 = vld [vmem:[%s1961_s4 + $0x20] sm:$0xff]  ;;  %v133_v11 = vld [vmem:[%s1961_s4 + $0x30] sm:$0xff] }
  0x70   :  { %v997_v9 = vpack.c.bf16 %v134_v7, %v132_v6  ;;  %994 = vmatprep.subr.bf16.mxu0 %v993_v4  ;;  %v288_v12 = vld [vmem:[#allocation10 + $0x8] sm:$0xff]  ;;  %v287_v13 = vld [vmem:[#allocation10] sm:$0xff]  ;;  %v999_v14 = vpack.c.bf16 %v133_v11, %v131_v10  ;;  %v224_v15 = vld [vmem:[%s1963_s6 + $0x8] sm:$0xff] }
  0x71   :  { %996 = vmatpush1.bf16.msra.mxu0 %v995_v8  ;;  %296 = vmatprep.subr.mxu1 %v288_v12  ;;  %v226_v16 = vld [vmem:[%s1963_s6 + $0x18] sm:$0xff]  ;;  %v125_v17 = vld [vmem:[%s1960_s3] sm:$0xff]  ;;  %v225_v20 = vld [vmem:[%s1963_s6 + $0x10] sm:$0xff] }
  0x72   :  { %998 = vmatprep.subr.bf16.mxu0 %v997_v9  ;;  %297 = vmatpush1.msra.mxu1 %v287_v13  ;;  %v1001_v18 = vpack.c.bf16 %v226_v16, %v224_v15  ;;  %v223_v19 = vld [vmem:[%s1963_s6] sm:$0xff]  ;;  %v228_v21 = vld [vmem:[%s1963_s6 + $0x28] sm:$0xff]  ;;  %v230_v23 = vld [vmem:[%s1963_s6 + $0x38] sm:$0xff] }
  0x73   :  { %894 = vmatmul.mubr.msk.f32.vlgmr.msra.gmra.mrb[0].mxu1 %vm289_vm0, %v125_v17  ;;  %v1003_v22 = vpack.c.bf16 %v225_v20, %v223_v19  ;;  %v227_v24 = vld [vmem:[%s1963_s6 + $0x20] sm:$0xff]  ;;  %v229_v25 = vld [vmem:[%s1963_s6 + $0x30] sm:$0xff]  ;;  %v1005_v26 = vpack.c.bf16 %v230_v23, %v228_v21  ;;  %v232_v27 = vld [vmem:[%s1963_s6 + $0x48] sm:$0xff] }
  0x74   :  { %1002 = vmatprep.subr.bf16.mxu1 %v1001_v18  ;;  %v234_v28 = vld [vmem:[%s1963_s6 + $0x58] sm:$0xff]  ;;  %366 = vmatprep.mubr.f32.mxu1 %v1335_v0  ;;  %v117_v29 = vld [vmem:[#allocation2] sm:$0xff]  ;;  %v1007_v30 = vpack.c.bf16 %v229_v25, %v227_v24  ;;  %v233_v33 = vld [vmem:[%s1963_s6 + $0x50] sm:$0xff] }
  0x75   :  { %1000 = vmatpush1.bf16.msra.mxu0 %v999_v14  ;;  %1004 = vmatpush1.bf16.msra.mxu1 %v1003_v22  ;;  %v1009_v31 = vpack.c.bf16 %v234_v28, %v232_v27  ;;  %v231_v32 = vld [vmem:[%s1963_s6 + $0x40] sm:$0xff]  ;;  %v236_v34 = vld [vmem:[%s1963_s6 + $0x68] sm:$0xff]  ;;  %v238_v35 = vld [vmem:[%s1963_s6 + $0x78] sm:$0xff] }
  0x76   :  { %1006 = vmatprep.subr.bf16.mxu1 %v1005_v26  ;;  %v118_v36 = vld [vmem:[#allocation2 + $0x8] sm:$0xff]  ;;  %v1011_v37 = vpack.c.bf16 %v233_v33, %v231_v32  ;;  %v1013_v38 = vpack.c.bf16 %v238_v35, %v236_v34  ;;  %v235_v39 = vld [vmem:[%s1963_s6 + $0x60] sm:$0xff]  ;;  %v237_v40 = vld [vmem:[%s1963_s6 + $0x70] sm:$0xff] }
  0x77   :  { %v240_v41 = vld [vmem:[%s1963_s6 + $0x88] sm:$0xff]  ;;  %v242_v42 = vld [vmem:[%s1963_s6 + $0x98] sm:$0xff]  ;;  %v1015_v43 = vpack.c.bf16 %v237_v40, %v235_v39  ;;  %v239_v45 = vld [vmem:[%s1963_s6 + $0x80] sm:$0xff] }
  0x78   :  { %892 = vmatmul.mubr.msk.f32.vlgmr.msra.gmra.mrb[0].mxu0 %vm135_vm1, %v117_v29  ;;  %v1017_v44 = vpack.c.bf16 %v242_v42, %v240_v41  ;;  %v241_v46 = vld [vmem:[%s1963_s6 + $0x90] sm:$0xff]  ;;  %v244_v47 = vld [vmem:[%s1963_s6 + $0xa8] sm:$0xff]  ;;  %v246_v48 = vld [vmem:[%s1963_s6 + $0xb8] sm:$0xff] }
  0x79   :  { %212 = vmatprep.mubr.f32.mxu0 %v1335_v0  ;;  %1008 = vmatpush1.bf16.msra.mxu1 %v1007_v30  ;;  %v1019_v49 = vpack.c.bf16 %v241_v46, %v239_v45  ;;  %v1021_v50 = vpack.c.bf16 %v246_v48, %v244_v47  ;;  %v243_v51 = vld [vmem:[%s1963_s6 + $0xa0] sm:$0xff]  ;;  %v245_v52 = vld [vmem:[%s1963_s6 + $0xb0] sm:$0xff]  ;;  %v248_v53 = vld [vmem:[%s1963_s6 + $0xc8] sm:$0xff] }
  0x7a   :  { %1010 = vmatprep.subr.bf16.mxu1 %v1009_v31  ;;  %v250_v54 = vld [vmem:[%s1963_s6 + $0xd8] sm:$0xff]  ;;  %v1023_v55 = vpack.c.bf16 %v245_v52, %v243_v51  ;;  %v247_v57 = vld [vmem:[%s1963_s6 + $0xc0] sm:$0xff]  ;;  %v249_v58 = vld [vmem:[%s1963_s6 + $0xd0] sm:$0xff] }
  0x7b   :  { %v1025_v56 = vpack.c.bf16 %v250_v54, %v248_v53  ;;  %v252_v59 = vld [vmem:[%s1963_s6 + $0xe8] sm:$0xff]  ;;  %v254_v60 = vld [vmem:[%s1963_s6 + $0xf8] sm:$0xff]  ;;  %v1027_v61 = vpack.c.bf16 %v249_v58, %v247_v57  ;;  %v251_v63 = vld [vmem:[%s1963_s6 + $0xe0] sm:$0xff] }
  0x7c   :  { %893 = vmatmul.mubr.msk.f32.gmra.mrb[2].mxu0 %vm135_vm1, %v118_v36  ;;  %v1029_v62 = vpack.c.bf16 %v254_v60, %v252_v59  ;;  %v253_v1 = vld [vmem:[%s1963_s6 + $0xf0] sm:$0xff]  ;;  %v256_v2 = vld [vmem:[%s1963_s6 + $0x108] sm:$0xff]  ;;  %v258_v3 = vld [vmem:[%s1963_s6 + $0x118] sm:$0xff] }
  0x7d   :  { %1012 = vmatpush1.bf16.msra.mxu1 %v1011_v37  ;;  %v1031_v4 = vpack.c.bf16 %v253_v1, %v251_v63  ;;  %v1033_v5 = vpack.c.bf16 %v258_v3, %v256_v2  ;;  %v255_v6 = vld [vmem:[%s1963_s6 + $0x100] sm:$0xff]  ;;  %v257_v7 = vld [vmem:[%s1963_s6 + $0x110] sm:$0xff]  ;;  %v260_v8 = vld [vmem:[%s1963_s6 + $0x128] sm:$0xff] }
  0x7e   :  { %1014 = vmatprep.subr.bf16.mxu1 %v1013_v38  ;;  %v262_v9 = vld [vmem:[%s1963_s6 + $0x138] sm:$0xff]  ;;  %v1035_v10 = vpack.c.bf16 %v257_v7, %v255_v6  ;;  %v259_v12 = vld [vmem:[%s1963_s6 + $0x120] sm:$0xff]  ;;  %v261_v13 = vld [vmem:[%s1963_s6 + $0x130] sm:$0xff] }
  0x7f   :  { %v1037_v11 = vpack.c.bf16 %v262_v9, %v260_v8  ;;  %v264_v14 = vld [vmem:[%s1963_s6 + $0x148] sm:$0xff]  ;;  %v266_v15 = vld [vmem:[%s1963_s6 + $0x158] sm:$0xff]  ;;  %v1039_v16 = vpack.c.bf16 %v261_v13, %v259_v12  ;;  %v263_v18 = vld [vmem:[%s1963_s6 + $0x140] sm:$0xff] }
  0x80   :  { %v1041_v17 = vpack.c.bf16 %v266_v15, %v264_v14  ;;  %v265_v19 = vld [vmem:[%s1963_s6 + $0x150] sm:$0xff]  ;;  %v268_v20 = vld [vmem:[%s1963_s6 + $0x168] sm:$0xff]  ;;  %v270_v21 = vld [vmem:[%s1963_s6 + $0x178] sm:$0xff] }
  0x81   :  { %1016 = vmatpush1.bf16.msra.mxu1 %v1015_v43  ;;  %v1043_v22 = vpack.c.bf16 %v265_v19, %v263_v18  ;;  %v1045_v23 = vpack.c.bf16 %v270_v21, %v268_v20  ;;  %v267_v24 = vld [vmem:[%s1963_s6 + $0x160] sm:$0xff]  ;;  %v269_v25 = vld [vmem:[%s1963_s6 + $0x170] sm:$0xff]  ;;  %v272_v26 = vld [vmem:[%s1963_s6 + $0x188] sm:$0xff] }
  0x82   :  { %1018 = vmatprep.subr.bf16.mxu1 %v1017_v44  ;;  %v274_v27 = vld [vmem:[%s1963_s6 + $0x198] sm:$0xff]  ;;  %v1047_v28 = vpack.c.bf16 %v269_v25, %v267_v24  ;;  %v271_v30 = vld [vmem:[%s1963_s6 + $0x180] sm:$0xff]  ;;  %v273_v31 = vld [vmem:[%s1963_s6 + $0x190] sm:$0xff] }
  0x83   :  { %v1049_v29 = vpack.c.bf16 %v274_v27, %v272_v26  ;;  %v276_v32 = vld [vmem:[%s1963_s6 + $0x1a8] sm:$0xff]  ;;  %v278_v33 = vld [vmem:[%s1963_s6 + $0x1b8] sm:$0xff]  ;;  %v1051_v34 = vpack.c.bf16 %v273_v31, %v271_v30  ;;  %v275_v36 = vld [vmem:[%s1963_s6 + $0x1a0] sm:$0xff] }
  0x84   :  { %v1053_v35 = vpack.c.bf16 %v278_v33, %v276_v32  ;;  %v277_v37 = vld [vmem:[%s1963_s6 + $0x1b0] sm:$0xff]  ;;  %v280_v38 = vld [vmem:[%s1963_s6 + $0x1c8] sm:$0xff]  ;;  %v282_v39 = vld [vmem:[%s1963_s6 + $0x1d8] sm:$0xff] }
  0x85   :  { %1020 = vmatpush1.bf16.msra.mxu1 %v1019_v49  ;;  %v1055_v40 = vpack.c.bf16 %v277_v37, %v275_v36  ;;  %v1057_v41 = vpack.c.bf16 %v282_v39, %v280_v38  ;;  %v279_v42 = vld [vmem:[%s1963_s6 + $0x1c0] sm:$0xff]  ;;  %v281_v43 = vld [vmem:[%s1963_s6 + $0x1d0] sm:$0xff]  ;;  %v284_v45 = vld [vmem:[%s1963_s6 + $0x1e8] sm:$0xff] }
  0x86   :  { %1022 = vmatprep.subr.bf16.mxu1 %v1021_v50  ;;  %v1059_v44 = vpack.c.bf16 %v281_v43, %v279_v42  ;;  %v286_v46 = vld [vmem:[%s1963_s6 + $0x1f8] sm:$0xff]  ;;  %v283_v48 = vld [vmem:[%s1963_s6 + $0x1e0] sm:$0xff]  ;;  %v285_v49 = vld [vmem:[%s1963_s6 + $0x1f0] sm:$0xff] }
  0x87   :  { %v1061_v47 = vpack.c.bf16 %v286_v46, %v284_v45  ;;  %v126_v50 = vld [vmem:[%s1960_s3 + $0x8] sm:$0xff]  ;;  %v1063_v51 = vpack.c.bf16 %v285_v49, %v283_v48  ;;  %v474_v52 = vld [vmem:[%s1965_s8 + $0x80] sm:$0xff]  ;;  %v476_v57 = vld [vmem:[%s1965_s8 + $0x90] sm:$0xff] }
  0x88   :  { %895 = vmatmul.mubr.msk.f32.gmra.mrb[2].mxu1 %vm289_vm0, %v126_v50  ;;  %v475_v53 = vld [vmem:[%s1965_s8 + $0x88] sm:$0xff]  ;;  %v458_v54 = vld [vmem:[%s1965_s8] sm:$0xff]  ;;  %v477_v58 = vld [vmem:[%s1965_s8 + $0x98] sm:$0xff] }
  0x89   :  { %1024 = vmatpush1.bf16.msra.mxu1 %v1023_v55  ;;  %v1065_v55 = vpack.c.bf16 %v475_v53, %v474_v52  ;;  %v1069_v60 = vpack.c.bf16 %v477_v58, %v476_v57  ;;  %v478_v63 = vld [vmem:[%s1965_s8 + $0xa0] sm:$0xff]  ;;  %v479_v1 = vld [vmem:[%s1965_s8 + $0xa8] sm:$0xff]  ;;  %v480_v6 = vld [vmem:[%s1965_s8 + $0xb0] sm:$0xff] }
  0x8a   :  { %1026 = vmatprep.subr.bf16.mxu1 %v1025_v56  ;;  %v459_v56 = vld [vmem:[%s1965_s8 + $0x8] sm:$0xff]  ;;  %v1073_v3 = vpack.c.bf16 %v479_v1, %v478_v63  ;;  %v481_v7 = vld [vmem:[%s1965_s8 + $0xb8] sm:$0xff]  ;;  %v482_v12 = vld [vmem:[%s1965_s8 + $0xc0] sm:$0xff] }
  0x8b   :  { %v1067_v59 = vpack.c.bf16 %v459_v56, %v458_v54  ;;  %1066 = vmatprep.subr.bf16.mxu0 %v1065_v55  ;;  %v1077_v9 = vpack.c.bf16 %v481_v7, %v480_v6  ;;  %v483_v13 = vld [vmem:[%s1965_s8 + $0xc8] sm:$0xff]  ;;  %v484_v18 = vld [vmem:[%s1965_s8 + $0xd0] sm:$0xff]  ;;  %v485_v19 = vld [vmem:[%s1965_s8 + $0xd8] sm:$0xff] }
  0x8c   :  { %v1081_v15 = vpack.c.bf16 %v483_v13, %v482_v12  ;;  %v1085_v21 = vpack.c.bf16 %v485_v19, %v484_v18  ;;  %v486_v24 = vld [vmem:[%s1965_s8 + $0xe0] sm:$0xff]  ;;  %v487_v25 = vld [vmem:[%s1965_s8 + $0xe8] sm:$0xff]  ;;  %v488_v43 = vld [vmem:[%s1965_s8 + $0xf0] sm:$0xff] }
  0x8d   :  { %1028 = vmatpush1.bf16.msra.mxu1 %v1027_v61  ;;  %v460_v61 = vld [vmem:[%s1965_s8 + $0x10] sm:$0xff]  ;;  %1068 = vmatpush3.bf16.msra.mxu0 %v1067_v59  ;;  %v1089_v27 = vpack.c.bf16 %v487_v25, %v486_v24  ;;  %v586_v6 = vld [vmem:[#allocation8 + $0x8] sm:$0xff]  ;;  %v585_v7 = vld [vmem:[#allocation8] sm:$0xff] }
  0x8e   :  { %1030 = vmatprep.subr.bf16.mxu1 %v1029_v62  ;;  %v461_v62 = vld [vmem:[%s1965_s8 + $0x18] sm:$0xff]  ;;  %1070 = vmatprep.subr.bf16.mxu0 %v1069_v60  ;;  %v472_v46 = vld [vmem:[%s1965_s8 + $0x70] sm:$0xff]  ;;  %v690_v18 = vld [vmem:[%s1967_s10 + $0x80] sm:$0xff] }
  0x8f   :  { %v1071_v2 = vpack.c.bf16 %v461_v62, %v460_v61  ;;  %v691_v19 = vld [vmem:[%s1967_s10 + $0x88] sm:$0xff] }
  0x91   :  { %1032 = vmatpush1.bf16.msra.mxu1 %v1031_v4  ;;  %v462_v4 = vld [vmem:[%s1965_s8 + $0x20] sm:$0xff]  ;;  %1072 = vmatpush3.bf16.msra.mxu0 %v1071_v2 }
  0x92   :  { %1034 = vmatprep.subr.bf16.mxu1 %v1033_v5  ;;  %v463_v5 = vld [vmem:[%s1965_s8 + $0x28] sm:$0xff]  ;;  %1074 = vmatprep.subr.bf16.mxu0 %v1073_v3 }
  0x93   :  { %v1075_v8 = vpack.c.bf16 %v463_v5, %v462_v4 }
  0x95   :  { %1036 = vmatpush1.bf16.msra.mxu1 %v1035_v10  ;;  %v464_v10 = vld [vmem:[%s1965_s8 + $0x30] sm:$0xff]  ;;  %1076 = vmatpush3.bf16.msra.mxu0 %v1075_v8 }
  0x96   :  { %1038 = vmatprep.subr.bf16.mxu1 %v1037_v11  ;;  %v465_v11 = vld [vmem:[%s1965_s8 + $0x38] sm:$0xff]  ;;  %1078 = vmatprep.subr.bf16.mxu0 %v1077_v9 }
  0x97   :  { %v1079_v14 = vpack.c.bf16 %v465_v11, %v464_v10 }
  0x99   :  { %1040 = vmatpush1.bf16.msra.mxu1 %v1039_v16  ;;  %v466_v16 = vld [vmem:[%s1965_s8 + $0x40] sm:$0xff]  ;;  %1080 = vmatpush3.bf16.msra.mxu0 %v1079_v14 }
  0x9a   :  { %1042 = vmatprep.subr.bf16.mxu1 %v1041_v17  ;;  %v467_v17 = vld [vmem:[%s1965_s8 + $0x48] sm:$0xff]  ;;  %1082 = vmatprep.subr.bf16.mxu0 %v1081_v15 }
  0x9b   :  { %v1083_v20 = vpack.c.bf16 %v467_v17, %v466_v16 }
  0x9d   :  { %1044 = vmatpush1.bf16.msra.mxu1 %v1043_v22  ;;  %v468_v22 = vld [vmem:[%s1965_s8 + $0x50] sm:$0xff]  ;;  %1084 = vmatpush3.bf16.msra.mxu0 %v1083_v20  ;;  %v674_v20 = vld [vmem:[%s1967_s10] sm:$0xff] }
  0x9e   :  { %1046 = vmatprep.subr.bf16.mxu1 %v1045_v23  ;;  %v469_v23 = vld [vmem:[%s1965_s8 + $0x58] sm:$0xff]  ;;  %1086 = vmatprep.subr.bf16.mxu0 %v1085_v21  ;;  %v1097_v21 = vpack.c.bf16 %v691_v19, %v690_v18 }
  0x9f   :  { %v1087_v26 = vpack.c.bf16 %v469_v23, %v468_v22  ;;  %v692_v22 = vld [vmem:[%s1967_s10 + $0x90] sm:$0xff]  ;;  %v693_v23 = vld [vmem:[%s1967_s10 + $0x98] sm:$0xff] }
  0xa0   :  { %v1101_v25 = vpack.c.bf16 %v693_v23, %v692_v22 }
  0xa1   :  { %1048 = vmatpush1.bf16.msra.mxu1 %v1047_v28  ;;  %1088 = vmatpush3.bf16.msra.mxu0 %v1087_v26  ;;  %v1800_v28 = vld [vmem:[#allocation7 + $0x8] sm:$0xff]  ;;  %v676_v26 = vld [vmem:[%s1967_s10 + $0x10] sm:$0xff] }
  0xa2   :  { %1050 = vmatprep.subr.bf16.mxu1 %v1049_v29  ;;  %1090 = vmatprep.subr.bf16.mxu0 %v1089_v27  ;;  %v1802_v29 = vld [vmem:[#allocation7] sm:$0xff]  ;;  %v677_v27 = vld [vmem:[%s1967_s10 + $0x18] sm:$0xff] }
  0xa5   :  { %1052 = vmatpush1.bf16.msra.mxu1 %v1051_v34  ;;  %v1806_v34 = vld [vmem:[#allocation7 + $0x18] sm:$0xff] }
  0xa6   :  { %1054 = vmatprep.subr.bf16.mxu1 %v1053_v35  ;;  %v1808_v35 = vld [vmem:[#allocation7 + $0x10] sm:$0xff] }
  0xa9   :  { %1056 = vmatpush1.bf16.msra.mxu1 %v1055_v40  ;;  %v470_v40 = vld [vmem:[%s1965_s8 + $0x60] sm:$0xff] }
  0xaa   :  { %1058 = vmatprep.subr.bf16.mxu1 %v1057_v41  ;;  %v471_v41 = vld [vmem:[%s1965_s8 + $0x68] sm:$0xff] }
  0xab   :  { %v1091_v42 = vpack.c.bf16 %v471_v41, %v470_v40 }
  0xad   :  { %1060 = vmatpush1.bf16.msra.mxu1 %v1059_v44  ;;  %1092 = vmatpush3.bf16.msra.mxu0 %v1091_v42  ;;  %v489_v44 = vld [vmem:[%s1965_s8 + $0xf8] sm:$0xff]  ;;  %v680_v42 = vld [vmem:[%s1967_s10 + $0x30] sm:$0xff] }
  0xae   :  { %1062 = vmatprep.subr.bf16.mxu1 %v1061_v47  ;;  %v1093_v45 = vpack.c.bf16 %v489_v44, %v488_v43  ;;  %v473_v47 = vld [vmem:[%s1965_s8 + $0x78] sm:$0xff]  ;;  %v698_v44 = vld [vmem:[%s1967_s10 + $0xc0] sm:$0xff] }
  0xaf   :  { %v1095_v48 = vpack.c.bf16 %v473_v47, %v472_v46  ;;  %v681_v43 = vld [vmem:[%s1967_s10 + $0x38] sm:$0xff] }
  0xb0   :  { %1094 = vmatprep.subr.bf16.mxu0 %v1093_v45  ;;  %v699_v45 = vld [vmem:[%s1967_s10 + $0xc8] sm:$0xff]  ;;  %v1111_v46 = vpack.c.bf16 %v681_v43, %v680_v42 }
  0xb1   :  { %1064 = vmatpush1.bf16.msra.mxu1 %v1063_v51  ;;  %1096 = vmatpush3.bf16.msra.mxu0 %v1095_v48  ;;  %v1113_v47 = vpack.c.bf16 %v699_v45, %v698_v44  ;;  %v682_v48 = vld [vmem:[%s1967_s10 + $0x40] sm:$0xff] }
  0xb2   :  { %593 = vmatprep.subr.mxu1 %v586_v6  ;;  %1098 = vmatprep.subr.bf16.mxu0 %v1097_v21  ;;  %v781_v6 = vld [vmem:[#allocation11] sm:$0xff] }
 0x14b   :  { %v208_v30 = vpop.f32.mrb[0].mxu0 }
 0x14c   :  { %v210_v31 = vpop.f32.mrb[1].mxu0  ;;  %v219_v33 = vmul.f32 %v208_v30, %v1802_v29  ;;  %v694_v30 = vld [vmem:[%s1967_s10 + $0xa0] sm:$0xff] }
 0x14d   :  { %v220_v32 = vmul.f32 %v210_v31, %v1800_v28  ;;  %v695_v31 = vld [vmem:[%s1967_s10 + $0xa8] sm:$0xff] }
 0x14f   :  { %v214_v36 = vpop.f32.mrb[2].mxu0  ;;  %437 = vmatprep.mubr.f32.mxu1 %v220_v32  ;;  %v1103_v32 = vpack.c.bf16 %v677_v27, %v676_v26 }
 0x150   :  { %v216_v37 = vpop.f32.mrb[3].mxu0  ;;  %438 = vmatmul.mubr.f32.vlgmr.msra.gmra.mrb[0].mxu1 %v219_v33  ;;  %v221_v39 = vmul.f32 %v214_v36, %v1808_v35  ;;  %v1105_v33 = vpack.c.bf16 %v695_v31, %v694_v30  ;;  %v678_v36 = vld [vmem:[%s1967_s10 + $0x20] sm:$0xff] }
 0x151   :  { %v222_v38 = vmul.f32 %v216_v37, %v1806_v34  ;;  %594 = vmatpush1.msra.mxu1 %v585_v7  ;;  %v679_v37 = vld [vmem:[%s1967_s10 + $0x28] sm:$0xff] }
 0x152   :  { %v1107_v40 = vpack.c.bf16 %v679_v37, %v678_v36  ;;  %v782_v7 = vld [vmem:[#allocation11 + $0x8] sm:$0xff] }
 0x153   :  { %443 = vmatprep.mubr.f32.mxu1 %v222_v38  ;;  %v696_v38 = vld [vmem:[%s1967_s10 + $0xb0] sm:$0xff] }
 0x154   :  { %444 = vmatmul.mubr.f32.gmra.mrb[2].mxu1 %v221_v39  ;;  %v697_v39 = vld [vmem:[%s1967_s10 + $0xb8] sm:$0xff] }
 0x155   :  { %657 = vmatprep.mubr.f32.mxu1 %v1335_v0  ;;  %v1109_v41 = vpack.c.bf16 %v697_v39, %v696_v38 }
 0x223   :  { %v439_v49 = vpop.f32.mrb[0].mxu1 }
 0x224   :  { %v450_v50 = vmul.f32 0.2, %v439_v49  ;;  %v441_v51 = vpop.f32.mrb[1].mxu1 }
 0x225   :  { %v451_v52 = vmul.f32 0.2, %v441_v51 }
 0x226   :  { %v454_v55 = vmax.f32 %v439_v49, %v450_v50  ;;  %v683_v49 = vld [vmem:[%s1967_s10 + $0x48] sm:$0xff]  ;;  %v700_v50 = vld [vmem:[%s1967_s10 + $0xd0] sm:$0xff] }
 0x227   :  { %v455_v53 = vmax.f32 %v441_v51, %v451_v52  ;;  %v445_v54 = vpop.f32.mrb[2].mxu1  ;;  %v701_v51 = vld [vmem:[%s1967_s10 + $0xd8] sm:$0xff]  ;;  %v1115_v52 = vpack.c.bf16 %v683_v49, %v682_v48 }
 0x228   :  { %v452_v56 = vmul.f32 0.2, %v445_v54  ;;  %v447_v57 = vpop.f32.mrb[3].mxu1 }
 0x229   :  { %v453_v58 = vmul.f32 0.2, %v447_v57  ;;  %554 = vmatprep.mubr.f32.mxu0 %v455_v53  ;;  %v1117_v53 = vpack.c.bf16 %v701_v51, %v700_v50 }
 0x22a   :  { %555 = vmatmul.mubr.f32.vlgmr.msra.gmra.mrb[4].mxu0 %v454_v55  ;;  %v456_v60 = vmax.f32 %v445_v54, %v452_v56  ;;  %v684_v54 = vld [vmem:[%s1967_s10 + $0x50] sm:$0xff]  ;;  %v685_v55 = vld [vmem:[%s1967_s10 + $0x58] sm:$0xff]  ;;  %v702_v56 = vld [vmem:[%s1967_s10 + $0xe0] sm:$0xff] }
 0x22b   :  { %v457_v59 = vmax.f32 %v447_v57, %v453_v58  ;;  %v703_v57 = vld [vmem:[%s1967_s10 + $0xe8] sm:$0xff]  ;;  %v1119_v58 = vpack.c.bf16 %v685_v55, %v684_v54 }
 0x22d   :  { %559 = vmatprep.mubr.f32.mxu0 %v457_v59  ;;  %v1121_v59 = vpack.c.bf16 %v703_v57, %v702_v56 }
 0x22e   :  { %560 = vmatmul.mubr.f32.gmra.mrb[6].mxu0 %v456_v60  ;;  %v686_v60 = vld [vmem:[%s1967_s10 + $0x60] sm:$0xff] }
 0x2fd   :  { %v932_v61 = vpop.f32.mrb[4].mxu0 }
 0x2fe   :  { %v933_v62 = vpop.f32.mrb[5].mxu0 }
 0x2ff   :  { %v934_v63 = vadd.f32 %v933_v62, %v932_v61  ;;  %v687_v61 = vld [vmem:[%s1967_s10 + $0x68] sm:$0xff] }
 0x300   :  { %v1123_v62 = vpack.c.bf16 %v687_v61, %v686_v60 }
 0x301   :  { %v935_v1 = vpop.f32.mrb[6].mxu0  ;;  %v565_v2 = vsel %vm289_vm0, %v934_v63, -inf }
 0x302   :  { %566 = vmax.xlane.f32.xlu0 %v565_v2  ;;  %v936_v3 = vpop.f32.mrb[7].mxu0 }
 0x303   :  { %v937_v4 = vadd.f32 %v936_v3, %v935_v1  ;;  %v705_v1 = vld [vmem:[%s1967_s10 + $0xf8] sm:$0xff]  ;;  %v688_v3 = vld [vmem:[%s1967_s10 + $0x70] sm:$0xff] }
 0x305   :  { %v568_v5 = vsel %vm289_vm0, %v937_v4, -inf }
 0x306   :  { %569 = vmax.xlane.f32.xlu0 %v568_v5 }
 0x38f   :  { %v567_v8 = vpop.xlane.xlu0 %566 }
 0x390   :  { %v571_v9 = vsub.f32 %v934_v63, %v567_v8  ;;  %v704_v63 = vld [vmem:[%s1967_s10 + $0xf0] sm:$0xff]  ;;  %v1129_v8 = vpack.c.bf16 %v782_v7, %v781_v6 }
 0x391   :  { %v1125_v2 = vpack.c.bf16 %v705_v1, %v704_v63 }
 0x392   :  { %v573_v10 = vmul.f32 1.442695, %v571_v9 }
 0x393   :  { %v570_v11 = vpop.xlane.xlu0 %569 }
 0x394   :  { %1153 = vpow2.f32 %v573_v10  ;;  %v572_v12 = vsub.f32 %v937_v4, %v570_v11  ;;  %v689_v4 = vld [vmem:[%s1967_s10 + $0x78] sm:$0xff]  ;;  %v783_v10 = vld [vmem:[#allocation11 + $0x10] sm:$0xff] }
 0x395   :  { %v1127_v5 = vpack.c.bf16 %v689_v4, %v688_v3  ;;  %v784_v11 = vld [vmem:[#allocation11 + $0x18] sm:$0xff] }
 0x396   :  { %v575_v13 = vmul.f32 1.442695, %v572_v12 }
 0x398   :  { %1155 = vpow2.f32 %v575_v13 }
 0x39e   :  { %v1154_v14 = vpop.eup %1153 }
 0x39f   :  { %896 = vmatmul.mubr.msk.f32.vlgmr.msra.gmra.mrb[4].mxu1 %vm289_vm0, %v1154_v14  ;;  %v577_v15 = vsel %vm289_vm0, %v1154_v14, 0.0 }
 0x3a0   :  { %578 = vadd.xlane.f32.xlu1 %v577_v15  ;;  %663 = vmatprep.mubr.f32.mxu1 %v1335_v0  ;;  %v675_v0 = vld [vmem:[%s1967_s10 + $0x8] sm:$0xff]  ;;  %v1133_v15 = vpack.c.bf16 %v784_v11, %v783_v10  ;;  %s1336_s10 = smov [#allocation13]  }
 0x3a1   :  { %v1099_v24 = vpack.c.bf16 %v675_v0, %v674_v20  ;;  %v119_v20 = vld [vmem:[#allocation5] sm:$0xff]  ;;  %s877_s15 = sshll.u32 %s1336_s10, 4  ;;  %s878_s15 = int_to_ptr.vmem [resolvable:$true] %s877_s15 }
 0x3a2   :  { %v1156_v16 = vpop.eup %1155  ;;  %s1293_s16 = scalar_lea.vmem %s878_s15, 256  ;;  %p1298_p7 = scmp.lt.s32.totalorder %s878_s15, %s878_s15 }
 0x3a3   :  { %897 = vmatmul.mubr.msk.f32.gmra.mrb[6].mxu1 %vm289_vm0, %v1156_v16  ;;  %v580_v17 = vsel %vm289_vm0, %v1156_v16, 0.0  ;;  %1100 = vmatpush3.bf16.msra.mxu0 %v1099_v24  ;;  %p1294_p6 = scmp.ne.s32.totalorder %s878_s15, %s1293_s16  ;;  %p1299_p8 = scmp.lt.s32.totalorder %s1293_s16, %s1293_s16 }
 0x3a4   :  { %581 = vadd.xlane.f32.xlu1 %v580_v17  ;;  %1102 = vmatprep.subr.bf16.mxu0 %v1101_v25 }
 0x3a5   :  { %p1300_p9 = por %p1299_p8, %p1298_p7 }
 0x3a7   :  { %1104 = vmatpush3.bf16.msra.mxu0 %v1103_v32  ;;  %p1301_p10 = pnand %p1300_p9, %p1294_p6 }
 0x3a8   :  { %1106 = vmatprep.subr.bf16.mxu0 %v1105_v33 }
 0x3ab   :  { %1108 = vmatpush3.bf16.msra.mxu0 %v1107_v40 }
 0x3ac   :  { %1110 = vmatprep.subr.bf16.mxu0 %v1109_v41 }
 0x3af   :  { %1112 = vmatpush3.bf16.msra.mxu0 %v1111_v46 }
 0x3b0   :  { %1114 = vmatprep.subr.bf16.mxu0 %v1113_v47 }
 0x3b3   :  { %1116 = vmatpush3.bf16.msra.mxu0 %v1115_v52 }
 0x3b4   :  { %1118 = vmatprep.subr.bf16.mxu0 %v1117_v53 }
 0x3b7   :  { %1120 = vmatpush3.bf16.msra.mxu0 %v1119_v58 }
 0x3b8   :  { %1122 = vmatprep.subr.bf16.mxu0 %v1121_v59 }
 0x3bb   :  { %1124 = vmatpush3.bf16.msra.mxu0 %v1123_v62 }
 0x3bc   :  { %1126 = vmatprep.subr.bf16.mxu0 %v1125_v2 }
 0x3bf   :  { %1128 = vmatpush3.bf16.msra.mxu0 %v1127_v5 }
 0x3c0   :  { %1130 = vmatprep.subr.bf16.mxu0 %v1129_v8 }
 0x472   :  { %v659_v9 = vpop.f32.mrb[4].mxu1 }
 0x473   :  { %v661_v12 = vpop.f32.mrb[5].mxu1  ;;  %v670_v14 = vmul.f32 %v659_v9, %v1802_v29  ;;  %v579_v29 = vpop.xlane.xlu1 %578 }
 0x474   :  { %v671_v13 = vmul.f32 %v661_v12, %v1800_v28  ;;  %v120_v28 = vld [vmem:[#allocation5 + $0x8] sm:$0xff]  ;;  %1157 = vrcp.f32 %v579_v29 }
 0x476   :  { %v665_v16 = vpop.f32.mrb[6].mxu1  ;;  %770 = vmatprep.mubr.f32.mxu0 %v671_v13 }
 0x477   :  { %v667_v17 = vpop.f32.mrb[7].mxu1  ;;  %771 = vmatmul.mubr.f32.vlgmr.msra.gmra.mrb[8].mxu0 %v670_v14  ;;  %v672_v19 = vmul.f32 %v665_v16, %v1808_v35  ;;  %v582_v21 = vpop.xlane.xlu1 %581 }
 0x478   :  { %v673_v18 = vmul.f32 %v667_v17, %v1806_v34  ;;  %1132 = vmatpush3.bf16.msra.mxu0 %v1129_v8  ;;  %1159 = vrcp.f32 %v582_v21 }
 0x479   :  { %1134 = vmatprep.subr.bf16.mxu0 %v1133_v15 }
 0x47a   :  { %775 = vmatprep.mubr.f32.mxu0 %v673_v18 }
 0x47b   :  { %776 = vmatmul.mubr.f32.gmra.mrb[10].mxu0 %v672_v19 }
 0x47c   :  { %1136 = vmatpush3.bf16.msra.mxu0 %v1133_v15  ;;  %990 = vmatprep.mubr.msk.f32.mxu0 %vm135_vm1, %v119_v20 }
 0x47e   :  { %v1158_v35 = vpop.eup %1157 }
 0x47f   :  { %991 = vmatmul.mubr.msk.f32.vlgmr.msra.gmra.mrb[12].mxu0 %vm135_vm1, %v120_v28 }
 0x482   :  { %v1160_v26 = vpop.eup %1159 }
 0x54a   :  { %v970_v0 = vpop.f32.mrb[8].mxu0 }
 0x54b   :  { %v971_v22 = vpop.f32.mrb[9].mxu0 }
 0x54c   :  { %v972_v34 = vadd.f32 %v971_v22, %v970_v0 }
 0x54e   :  { %v973_v23 = vpop.f32.mrb[10].mxu0  ;;  %v785_v31 = vmul.f32 %v1158_v35, %v972_v34 }
 0x54f   :  { %v974_v24 = vpop.f32.mrb[11].mxu0 }
 0x550   :  { %v975_v25 = vadd.f32 %v974_v24, %v973_v23 }
 0x552   :  { %v786_v27 = vmul.f32 %v1160_v26, %v975_v25  ;;  %v992_v30 = vpop.f32.mrb[12].mxu0 }
 0x553   :  { %v859_v32 = vpop.f32.mrb[13].mxu0 }
 0x554   :  { %v865_v33 = vadd.f32 %v992_v30, %v786_v27  ;;  %v860_v36 = vadd.f32 %v859_v32, %v785_v31 }
 0x556   :  { %v869_v37 = vmax.f32 %v865_v33, 0.0  ;;  %v868_v38 = vmax.f32 %v860_v36, 0.0 }
 0x558   :  { %871 = vst.msk [vmem:[#allocation13 + $0x8] sm:$0xff] %vm135_vm1, %v869_v37  ;;  %870 = vst.msk [vmem:[#allocation13] sm:$0xff] %vm135_vm1, %v868_v38 }
 0x559   :  { %1304 = shalt.err (!%p1301_p10)
}
 0x55a   :  { %s1305_s19 = scalar_lea.hbm %s1968_s11, 256 }
 0x55b   :  { %p1306_p11 = scmp.ne.s32.totalorder %s1968_s11, %s1305_s19  ;;  %p1309_p12 = scmp.lt.u32.totalorder %s1305_s19, %s1968_s11 }
 0x55d   :  { %p1311_p13 = pnand %p1309_p12, %p1306_p11 }
 0x55f   :  { %1314 = shalt.err (!%p1311_p13)
}
 0x560   :  { %883 = dma.vmem_to_hbm [thread:$0]  %s878_s15, 256, %s1968_s11, [#allocation4], %s1327_s29, %s1327_s29, %s1328_s30  }
 0x561   :  { %1323 = dma.done.wait [#allocation4], 256  }
 0x562   :  { %1324 = vsyncadd [#allocation4], 4294967040 }
 0x563   :  { %887 = vsyncpa [#allocation3], 1 }
 0x564   :  { %888 = vsyncpa [#allocation6], 1 }
 0x565   :  { %889 = vsyncpa [#allocation9], 1 }
 0x566   :  { %890 = vsyncpa [#allocation12], 1 }
 0x567   :  { %891 = vsyncpa [#allocation4], 1 }

</bundles_post_ra>
